<compile_context>
chip_gen: v5e
topology: v5e:2x2
jax: 0.10.0
libtpu: 0.0.40
codegen_flags: <defaults>
</compile_context>

<pallas_src>
import jax
import jax.numpy as jnp
from jax.experimental import pallas as pl
from jax.experimental.pallas import tpu as pltpu


_TARGET_TILE_BYTES = 6 * 1024 * 1024      # ~6 MiB/tile; 4x buffers = 24 MiB
_VMEM_LIMIT_BYTES = 40 * 1024 * 1024      # explicit scoped-VMEM budget
_MIN_PIPELINE_BYTES = 1 << 20             # below this a single block is fine
_MAX_LANES = 4096


def _affine_kernel(gb_ref, x_ref, o_ref):
    # gb_ref: (2,) f32 in SMEM (scalar-prefetched): [gain, bias]
    g = gb_ref[0]
    b = gb_ref[1]
    o_ref[...] = (x_ref[...].astype(jnp.float32) * g + b).astype(o_ref.dtype)


def _choose_lanes(n, max_lanes=_MAX_LANES):
    """Largest multiple of 128 that divides n (<= max_lanes), or 0 if none."""
    cand = max_lanes
    while cand >= 128:
        if n % cand == 0:
            return cand
        cand -= 128
    return 0


def _choose_block_rows(rows, lanes, itemsize, sublane_mult):
    total_bytes = rows * lanes * itemsize
    if total_bytes <= _MIN_PIPELINE_BYTES or rows <= sublane_mult:
        return rows
    # ~6 MiB tiles, rounded to the dtype's native sublane multiple.
    target_rows = max(1, _TARGET_TILE_BYTES // (lanes * itemsize))
    target_rows = max(sublane_mult, (target_rows // sublane_mult) * sublane_mult)
    # Guarantee >= ~4 grid steps so the DMA pipeline stays busy and both v7x
    # TensorCores get work (grid=(1,) can't be megacore-sharded).
    want = -(-rows // 4)
    want = ((want + sublane_mult - 1) // sublane_mult) * sublane_mult
    block_rows = min(target_rows, want)
    return max(sublane_mult, min(block_rows, rows))


def _affine_2d(x2, gb, block_rows):
    rows, lanes = x2.shape
    itemsize = jnp.dtype(x2.dtype).itemsize
    n = rows * lanes
    grid = (pl.cdiv(rows, block_rows),)
    return pl.pallas_call(
        _affine_kernel,
        out_shape=jax.ShapeDtypeStruct((rows, lanes), x2.dtype),
        grid_spec=pltpu.PrefetchScalarGridSpec(
            num_scalar_prefetch=1,
            grid=grid,
            in_specs=[pl.BlockSpec((block_rows, lanes), lambda i, gb_ref: (i, 0))],
            out_specs=pl.BlockSpec((block_rows, lanes), lambda i, gb_ref: (i, 0)),
        ),
        compiler_params=pltpu.CompilerParams(
            dimension_semantics=("parallel",),
            vmem_limit_bytes=_VMEM_LIMIT_BYTES,
        ),
        cost_estimate=pl.CostEstimate(
            flops=2 * n,
            transcendentals=0,
            bytes_accessed=2 * n * itemsize,
        ),
    )(gb, x2)


def _affine_flat(flat, gb, itemsize, sublane_mult):
    """Run the lane-dense kernel on a flat vector whose size % 128 == 0."""
    n = flat.size
    lanes = _choose_lanes(n)
    rows = n // lanes
    x2 = flat.reshape(rows, lanes)
    block_rows = _choose_block_rows(rows, lanes, itemsize, sublane_mult)
    return _affine_2d(x2, gb, block_rows).reshape(-1)


def affine_forward(x, gain, bias):
    """y = x * gain + bias with scalar gain/bias, via a Pallas TPU kernel."""
    orig_shape = x.shape
    out_dtype = x.dtype
    n = x.size
    if n == 0:
        return x

    gb = jnp.stack([
        jnp.asarray(gain, dtype=jnp.float32).reshape(()),
        jnp.asarray(bias, dtype=jnp.float32).reshape(()),
    ])

    itemsize = jnp.dtype(out_dtype).itemsize
    # Native sublane packing: 8 for 32-bit, 16 for bf16, 32 for int8.
    sublane_mult = max(8, 32 // max(1, itemsize))

    flat = x.reshape(-1)

    if n % 128 == 0:
        # Main (pad-free) path: lane-dense slab, exactly 2n bytes of traffic.
        return _affine_flat(flat, gb, itemsize, sublane_mult).reshape(orig_shape)

    # Bulk + tail split (odd element counts): kernel on the largest
    # 128-divisible prefix, tiny remainder (<128 elems) in plain jnp.
    g = gb[0]
    b = gb[1]
    bulk_n = (n // 128) * 128
    if bulk_n == 0:
        y = (flat.astype(jnp.float32) * g + b).astype(out_dtype)
        return y.reshape(orig_shape)
    y_bulk = _affine_flat(flat[:bulk_n], gb, itemsize, sublane_mult)
    y_tail = (flat[bulk_n:].astype(jnp.float32) * g + b).astype(out_dtype)
    return jnp.concatenate([y_bulk, y_tail]).reshape(orig_shape)


if __name__ == "__main__":
    key = jax.random.PRNGKey(0)
    # Small NCHW input consistent with a conv-style emulator front-end.
    x = jax.random.normal(key, (2, 4, 16, 16), dtype=jnp.float32)

    # nn.Parameter(torch.ones(1)) / nn.Parameter(torch.zeros(1)), perturbed
    # so the op is non-trivial.
    gain = jnp.ones((1,), dtype=jnp.float32) * 1.5
    bias = jnp.zeros((1,), dtype=jnp.float32) + 0.25

    y = affine_forward(x, gain, bias)
    y = jax.block_until_ready(y)
    y_ref = x * gain[0] + bias[0]
    assert y.shape == x.shape and y.dtype == x.dtype
    assert jnp.allclose(y, y_ref, atol=1e-6, rtol=1e-6)

    # Exercise the bulk+tail path (element count not divisible by 128).
    x_odd = jax.random.normal(jax.random.PRNGKey(1), (5, 97), dtype=jnp.float32)
    y_odd = jax.block_until_ready(affine_forward(x_odd, gain, bias))
    y_odd_ref = x_odd * gain[0] + bias[0]
    assert jnp.allclose(y_odd, y_odd_ref, atol=1e-6, rtol=1e-6)

    print("KERNEL_OK")
</pallas_src>

<mosaic_0001>
module attributes {stable_mosaic.version = 11 : i64} {
  func.func @_affine_kernel(%arg0: i32, %arg1: memref<2xf32, #tpu.memory_space<smem>>, %arg2: memref<1x2048xf32, #tpu.memory_space<vmem>>, %arg3: memref<1x2048xf32, #tpu.memory_space<vmem>>) attributes {dimension_semantics = [#tpu.dimension_semantics<parallel>], iteration_bounds = array<i64: 1>, scalar_prefetch = 1 : i64, scratch_operands = 0 : i64, tpu.core_type = #tpu.core_type<tc>, window_params = [{transform_indices = @transform_0, window_bounds = array<i64: 1, 2048>}, {transform_indices = @transform_1, window_bounds = array<i64: 1, 2048>}]} {
    %c0 = arith.constant 0 : index
    %0 = memref.load %arg1[%c0] : memref<2xf32, #tpu.memory_space<smem>>
    %c1 = arith.constant 1 : index
    %1 = memref.load %arg1[%c1] : memref<2xf32, #tpu.memory_space<smem>>
    %c0_0 = arith.constant 0 : index
    %c0_1 = arith.constant 0 : index
    %2 = vector.load %arg2[%c0_0, %c0_1] : memref<1x2048xf32, #tpu.memory_space<vmem>>, vector<1x2048xf32>
    %3 = vector.broadcast %0 : f32 to vector<1x2048xf32>
    %4 = arith.mulf %2, %3 : vector<1x2048xf32>
    %5 = vector.broadcast %1 : f32 to vector<1x2048xf32>
    %6 = arith.addf %4, %5 : vector<1x2048xf32>
    %c0_2 = arith.constant 0 : index
    %c0_3 = arith.constant 0 : index
    %7 = vector.load %arg3[%c0_2, %c0_3] : memref<1x2048xf32, #tpu.memory_space<vmem>>, vector<1x2048xf32>
    tpu.vector_store %arg3[%c0_2, %c0_3], %6 {strides = array<i32>} : memref<1x2048xf32, #tpu.memory_space<vmem>>, vector<1x2048xf32>,
    return
  }
  func.func @transform_0(%arg0: i32, %arg1: memref<2xf32, #tpu.memory_space<smem>>) -> (i32, i32) {
    %c0_i32 = arith.constant 0 : i32
    %c0_i32_0 = arith.constant 0 : i32
    return %arg0, %c0_i32 : i32, i32
  }
  func.func @transform_1(%arg0: i32, %arg1: memref<2xf32, #tpu.memory_space<smem>>) -> (i32, i32) {
    %c0_i32 = arith.constant 0 : i32
    %c0_i32_0 = arith.constant 0 : i32
    return %arg0, %c0_i32 : i32, i32
  }
}

</mosaic_0001>

<bundles_post_ra>
// kernel: tpu_custom_call.1
= control target key start
LH: loop header
LB: loop body
LE: loop exit
PB: predicated region body
PF: predicated region fallthrough
CT: control target
= control target key end

     0   :  { %s131_s12 = smov [#allocation3]   ;;  %s158_s0 = inlined_call_operand.hbm [shape: f32[2], index: 0, kind: input, shape index: {}]   ;;  %s159_s1 = inlined_call_operand.hbm [shape: f32[1,2048], index: 1, kind: input, shape index: {}]   ;;  %s160_s2 = inlined_call_operand.hbm [shape: f32[1,2048], index: 2, kind: output, shape index: {}]  }
   0x1   :  { %s8_s11 = sshll.u32 %s158_s0, 4  ;;  %s9_s11 = int_to_ptr.hbm [resolvable:$true] %s8_s11 }
   0x2   :  { %11 = dma.hbm_to_smem %s9_s11, 16, %s131_s12, [#allocation2] }
   0x3   :  { %125 = dma.done.wait [#allocation2], 16 }
   0x4   :  { %126 = vsyncadd [#allocation2], 4294967280 }
   0x5   :  { %14 = sfence }
   0x6   :  { %15 = vsyncpa [#allocation5], 0 }
   0x7   :  { %16 = vsyncpa [#allocation6], 0  ;;  %s22_s15 = sshll.u32 %s159_s1, 4  ;;  %s132_s16 = smov [#allocation4]   ;;  %s23_s15 = int_to_ptr.hbm [resolvable:$true] %s22_s15 }
   0x8   :  { %s24_s17 = sshll.u32 %s132_s16, 4  ;;  %s25_s17 = int_to_ptr.vmem [resolvable:$true] %s24_s17 }
   0x9   :  { %27 = dma.hbm_to_vmem [thread:$0]  %s23_s15, 256, %s25_s17, [#allocation5]  }
   0xa   :  { %127 = dma.done.wait [#allocation5], 256  }
   0xb   :  { %128 = vsyncadd [#allocation5], 4294967040  ;;  %s32_s0 = sld [smem:[#allocation3]]  ;;  %v34_v0 = vld [vmem:[#allocation4] sm:$0xff]  ;;  %v35_v2 = vld [vmem:[#allocation4 + $0x8] sm:$0xff]  ;;  %s133_s19 = smov [#allocation7]  }
   0xc   :  { %s61_s18 = sld [smem:[#allocation3 + $0x1]]  ;;  %s49_s20 = sshll.u32 %s133_s19, 4  ;;  %s50_s20 = int_to_ptr.vmem [resolvable:$true] %s49_s20 }
   0xd   :  { %s51_s1 = sshll.u32 %s160_s2, 4  ;;  %s52_s1 = int_to_ptr.hbm [resolvable:$true] %s51_s1 }
  0x11   :  { %v36_v1 = vstv %s32_s0 }
  0x12   :  { %v37_v3 = vmul.f32 %v36_v1, %v34_v0  ;;  %v39_v4 = vstv %s61_s18  ;;  %v38_v5 = vmul.f32 %v36_v1, %v35_v2 }
  0x14   :  { %v40_v6 = vadd.f32 %v39_v4, %v37_v3  ;;  %v41_v7 = vadd.f32 %v39_v4, %v38_v5 }
  0x16   :  { %42 = vst [vmem:[#allocation7] sm:$0xff] %v40_v6 }
  0x17   :  { %43 = vst [vmem:[#allocation7 + $0x8] sm:$0xff] %v41_v7 }
  0x18   :  { %54 = dma.vmem_to_hbm [thread:$0]  %s50_s20, 256, %s52_s1, [#allocation6]  }
  0x19   :  { %129 = dma.done.wait [#allocation6], 256  }
  0x1a   :  { %130 = vsyncadd [#allocation6], 4294967040 }
  0x1b   :  { %59 = vsyncpa [#allocation5], 1 }
  0x1c   :  { %60 = vsyncpa [#allocation6], 1 }

</bundles_post_ra>
